<compile_context>
chip_gen: v6e
topology: v6e:2x2x1
jax: 0.10.0
libtpu: 0.0.40
codegen_flags: <defaults>
</compile_context>

<pallas_src>
import jax
import jax.numpy as jnp
from jax.experimental import pallas as pl
from jax.experimental.pallas import tpu as pltpu


def _normalization_kernel(scale_ref, bias_ref, img_ref, out_ref):
    # scale_ref / bias_ref : VMEM (rows_per_block, 1) f32, broadcast over lanes
    # img_ref / out_ref    : VMEM (rows_per_block, H*W) tile
    x = img_ref[...].astype(jnp.float32)
    out_ref[...] = (x * scale_ref[...] + bias_ref[...]).astype(out_ref.dtype)


def _choose_rows_per_block(rows: int, cols: int, itemsize: int,
                           target_bytes: int = 2 << 20) -> int:
    """Pick a row-block size giving ~2 MiB tiles (safe on v5e/v6e/v7x)."""
    row_bytes = cols * itemsize
    target_rows = max(1, target_bytes // row_bytes)
    if target_rows >= rows:
        return rows  # single block covering the whole array
    rpb = max(8, int(target_rows // 8) * 8)  # keep sublane-aligned (multiple of 8)
    return min(rpb, rows)


def normalization(img: jax.Array, mean: jax.Array, std: jax.Array) -> jax.Array:
    """(img - mean[c]) / std[c] for NCHW img; mean/std are (C,)."""
    n, c, h, w = img.shape
    rows, cols = n * c, h * w

    # Precompute per-row scale/bias in f32 (out = img * scale + bias).
    scale = 1.0 / std.reshape(-1).astype(jnp.float32)
    bias = -mean.reshape(-1).astype(jnp.float32) * scale
    scale_rows = jnp.tile(scale, n).reshape(rows, 1)
    bias_rows = jnp.tile(bias, n).reshape(rows, 1)

    img2d = img.reshape(rows, cols)

    rpb = _choose_rows_per_block(rows, cols, img.dtype.itemsize)
    grid = (pl.cdiv(rows, rpb),)

    nbytes = rows * cols * img.dtype.itemsize
    cost = pl.CostEstimate(
        flops=2 * rows * cols,
        transcendentals=0,
        bytes_accessed=2 * nbytes + 2 * rows * 4,
    )

    out2d = pl.pallas_call(
        _normalization_kernel,
        out_shape=jax.ShapeDtypeStruct((rows, cols), img.dtype),
        grid=grid,
        in_specs=[
            pl.BlockSpec((rpb, 1), lambda i: (i, 0)),      # scale rows (f32)
            pl.BlockSpec((rpb, 1), lambda i: (i, 0)),      # bias rows  (f32)
            pl.BlockSpec((rpb, cols), lambda i: (i, 0)),   # image rows
        ],
        out_specs=pl.BlockSpec((rpb, cols), lambda i: (i, 0)),
        compiler_params=pltpu.CompilerParams(
            dimension_semantics=("parallel",),
        ),
        cost_estimate=cost,
    )(scale_rows, bias_rows, img2d)

    return out2d.reshape(n, c, h, w)


if __name__ == "__main__":
    key = jax.random.PRNGKey(0)
    N, C, H, W = 2, 4, 16, 16

    # Deterministic "ImageNet-like" per-channel stats for C=4 channels.
    mean = jnp.array([0.485, 0.456, 0.406, 0.5], dtype=jnp.float32)
    std = jnp.array([0.229, 0.224, 0.225, 0.25], dtype=jnp.float32)

    img = jax.random.uniform(key, (N, C, H, W), dtype=jnp.float32)

    out = normalization(img, mean, std)
    jax.block_until_ready(out)

    # Reference check (plain JAX, mirrors PyTorch broadcasting semantics).
    ref = (img - mean.reshape(-1, 1, 1)) / std.reshape(-1, 1, 1)
    assert out.shape == img.shape
    assert jnp.allclose(out, ref, rtol=1e-5, atol=1e-5)

    print("KERNEL_OK")
</pallas_src>

<mosaic_0001>
module attributes {stable_mosaic.version = 11 : i64} {
  func.func @_normalization_kernel(%arg0: i32, %arg1: memref<8x1xf32, #tpu.memory_space<vmem>>, %arg2: memref<8x1xf32, #tpu.memory_space<vmem>>, %arg3: memref<8x256xf32, #tpu.memory_space<vmem>>, %arg4: memref<8x256xf32, #tpu.memory_space<vmem>>) attributes {dimension_semantics = [#tpu.dimension_semantics<parallel>], iteration_bounds = array<i64: 1>, scalar_prefetch = 0 : i64, scratch_operands = 0 : i64, tpu.core_type = #tpu.core_type<tc>, window_params = [{transform_indices = @transform_0, window_bounds = array<i64: 8, 1>}, {transform_indices = @transform_1, window_bounds = array<i64: 8, 1>}, {transform_indices = @transform_2, window_bounds = array<i64: 8, 256>}, {transform_indices = @transform_3, window_bounds = array<i64: 8, 256>}]} {
    %c0 = arith.constant 0 : index
    %c0_0 = arith.constant 0 : index
    %0 = vector.load %arg3[%c0, %c0_0] : memref<8x256xf32, #tpu.memory_space<vmem>>, vector<8x256xf32>
    %c0_1 = arith.constant 0 : index
    %c0_2 = arith.constant 0 : index
    %1 = vector.load %arg1[%c0_1, %c0_2] : memref<8x1xf32, #tpu.memory_space<vmem>>, vector<8x1xf32>
    %2 = vector.broadcast %1 : vector<8x1xf32> to vector<8x256xf32>
    %3 = arith.mulf %0, %2 : vector<8x256xf32>
    %c0_3 = arith.constant 0 : index
    %c0_4 = arith.constant 0 : index
    %4 = vector.load %arg2[%c0_3, %c0_4] : memref<8x1xf32, #tpu.memory_space<vmem>>, vector<8x1xf32>
    %5 = vector.broadcast %4 : vector<8x1xf32> to vector<8x256xf32>
    %6 = arith.addf %3, %5 : vector<8x256xf32>
    %c0_5 = arith.constant 0 : index
    %c0_6 = arith.constant 0 : index
    %7 = vector.load %arg4[%c0_5, %c0_6] : memref<8x256xf32, #tpu.memory_space<vmem>>, vector<8x256xf32>
    tpu.vector_store %arg4[%c0_5, %c0_6], %6 {strides = array<i32>} : memref<8x256xf32, #tpu.memory_space<vmem>>, vector<8x256xf32>,
    return
  }
  func.func @transform_0(%arg0: i32) -> (i32, i32) {
    %c0_i32 = arith.constant 0 : i32
    %c0_i32_0 = arith.constant 0 : i32
    return %arg0, %c0_i32 : i32, i32
  }
  func.func @transform_1(%arg0: i32) -> (i32, i32) {
    %c0_i32 = arith.constant 0 : i32
    %c0_i32_0 = arith.constant 0 : i32
    return %arg0, %c0_i32 : i32, i32
  }
  func.func @transform_2(%arg0: i32) -> (i32, i32) {
    %c0_i32 = arith.constant 0 : i32
    %c0_i32_0 = arith.constant 0 : i32
    return %arg0, %c0_i32 : i32, i32
  }
  func.func @transform_3(%arg0: i32) -> (i32, i32) {
    %c0_i32 = arith.constant 0 : i32
    %c0_i32_0 = arith.constant 0 : i32
    return %arg0, %c0_i32 : i32, i32
  }
}

</mosaic_0001>

<bundles_post_ra>
// kernel: tpu_custom_call.1
= control target key start
LH: loop header
LB: loop body
LE: loop exit
PB: predicated region body
PF: predicated region fallthrough
CT: control target
= control target key end

     0   :  { %v74_v1 = vmov 0   ;;  %s111_s0 = inlined_call_operand.vmem [shape: f32[8,1], index: 0, kind: input, shape index: {}]   ;;  %s112_s1 = inlined_call_operand.vmem [shape: f32[8,1], index: 1, kind: input, shape index: {}]   ;;  %s113_s2 = inlined_call_operand.vmem [shape: f32[8,256], index: 2, kind: input, shape index: {}]   ;;  %s114_s3 = inlined_call_operand.hbm [shape: f32[8,256], index: 3, kind: output, shape index: {}]  }
   0x1   :  { %v17_v0 = vld [vmem:[%s111_s0] sm:$0xff]  ;;  %51 = vset.pattern.permute.xlu0 %v74_v1 }
   0x2   :  { %8 = vsyncpa [#allocation3], 0  ;;  %20 = vperm.xlu0 %51, %v17_v0   ;;  %v25_v2 = vld [vmem:[%s112_s1] sm:$0xff]  ;;  %v16_v5 = vld [vmem:[%s113_s2 + $0x8] sm:$0xff]  ;;  %s75_s20 = smov [#allocation2]  }
   0x3   :  { %v15_v4 = vld [vmem:[%s113_s2] sm:$0xff]  ;;  %s41_s0 = sshll.u32 %s75_s20, 4  ;;  %s42_s0 = int_to_ptr.vmem [resolvable:$true] %s41_s0 }
   0x4   :  { %s52_s1 = scalar_lea.vmem %s42_s0, 256  ;;  %p57_p1 = scmp.lt.s32.totalorder %s42_s0, %s42_s0 }
   0x5   :  { %p53_p0 = scmp.ne.s32.totalorder %s42_s0, %s52_s1  ;;  %p58_p2 = scmp.lt.s32.totalorder %s52_s1, %s52_s1 }
   0x6   :  { %28 = vperm.xlu0 %51, %v25_v2  }
   0x7   :  { %p59_p3 = por %p58_p2, %p57_p1 }
   0x9   :  { %p60_p4 = pnand %p59_p3, %p53_p0 }
  0x7d   :  { %v21_v3 = vpop.permute.xlu0 %20 }
  0x7e   :  { %v23_v6 = vmul.f32 %v21_v3, %v15_v4  ;;  %v24_v7 = vmul.f32 %v21_v3, %v16_v5 }
  0x81   :  { %v29_v8 = vpop.permute.xlu0 %28 }
  0x82   :  { %v31_v9 = vadd.f32 %v29_v8, %v23_v6  ;;  %v32_v10 = vadd.f32 %v29_v8, %v24_v7 }
  0x84   :  { %33 = vst [vmem:[#allocation2] sm:$0xff] %v31_v9  ;;  %34 = vst [vmem:[#allocation2 + $0x8] sm:$0xff] %v32_v10 }
  0x85   :  { %63 = shalt.err (!%p60_p4)
}
  0x86   :  { %44 = dma.vmem_to_hbm [thread:$0]  %s42_s0, 256, %s114_s3, [#allocation3]  }
  0x87   :  { %72 = dma.done.wait [#allocation3], 256  }
  0x88   :  { %73 = vsyncadd [#allocation3], 4294967040 }
  0x89   :  { %48 = vsyncpa [#allocation3], 1 }

</bundles_post_ra>
